<compile_context>
chip_gen: v7x
topology: tpu7x:2x2x1
jax: 0.10.0
libtpu: 0.0.40
codegen_flags: <defaults>
</compile_context>

<pallas_src>
import functools

import jax
import jax.numpy as jnp
from jax import lax
from jax.experimental import pallas as pl
from jax.experimental.pallas import tpu as pltpu


def _round_up(x, m):
    return (x + m - 1) // m * m


_ONEHOT_CHUNK = 512  # episode-axis chunk for the in-kernel one-hot time lookup


def _rsa_fused_kernel(s_ref, a_ref, r_ref, t_ref,
                      ws_ref, wa_ref, wr_ref, tab_ref, c_ref, out_ref):
    # s_ref:   (TILE, S) f32  states
    # a_ref:   (TILE, A) f32  actions
    # r_ref:   (TILE, 1) f32  returns_to_go
    # t_ref:   (TILE, 1) i32  timesteps
    # ws_ref:  (S, P)  f32    Ws @ Wf
    # wa_ref:  (A, P)  f32    Wa @ Wf
    # wr_ref:  (1, P)  f32    Wr @ Wf
    # tab_ref: (E, P)  f32    time_table @ Wf   (grid-invariant, VMEM resident)
    # c_ref:   (5, P)  f32    rows = [b_return, b_state, b_action, gamma, beta]
    # out_ref: (TILE, 3P) f32 interleaved (return, state, action) tokens per row
    tile = s_ref.shape[0]
    p = ws_ref.shape[-1]
    e_tot = tab_ref.shape[0]

    # ---- timestep embedding: chunked one-hot @ pre-projected table (MXU) ----
    # (Out-of-range timesteps yield a zero embedding instead of XLA's clamp.)
    t_col = t_ref[...]                                        # (TILE, 1) int32
    temb = jnp.zeros((tile, p), jnp.float32)
    for e0 in range(0, e_tot, _ONEHOT_CHUNK):
        w = min(_ONEHOT_CHUNK, e_tot - e0)
        ids = lax.broadcasted_iota(jnp.int32, (tile, w), 1) + e0
        onehot = (t_col == ids).astype(jnp.float32)           # (TILE, w)
        temb = temb + jnp.dot(onehot, tab_ref[e0:e0 + w, :],
                              preferred_element_type=jnp.float32)

    gamma = c_ref[3:4, :]
    beta = c_ref[4:5, :]

    # Token order per timestep is (return, state, action), matching the torch
    # stack(...).permute(...) interleave; chunk k lands at lanes [k*P, (k+1)*P).
    srcs = ((r_ref, wr_ref, True),     # returns_to_go (1 feature -> broadcast mul)
            (s_ref, ws_ref, False),    # states
            (a_ref, wa_ref, False))    # actions
    for k, (x_ref, w_ref, scalar_feat) in enumerate(srcs):
        if scalar_feat:
            chunk = x_ref[...] * w_ref[...]                   # (TILE,1)*(1,P)
        else:
            chunk = jnp.dot(x_ref[...], w_ref[...],
                            preferred_element_type=jnp.float32)
        chunk = chunk + c_ref[k:k + 1, :] + temb
        mean = jnp.mean(chunk, axis=-1, keepdims=True)
        cen = chunk - mean
        var = jnp.mean(cen * cen, axis=-1, keepdims=True)
        out_ref[:, k * p:(k + 1) * p] = (
            cen * lax.rsqrt(var + 1e-12) * gamma + beta)


@functools.partial(jax.jit, static_argnames=("max_tile",))
def rsa_embeddings(states, actions, rewards, returns_to_go, timesteps, params,
                   *, max_tile=1024):
    """Fused RSAEmbeddings forward.  Returns (B, 3*T, P) float32."""
    del rewards                               # unused by the reference forward as well
    B, T, S = states.shape
    A = actions.shape[-1]
    H, P = params["wf"].shape
    E = params["time_table"].shape[0]
    rows = B * T
    P3 = 3 * P

    # TODO(synk): general P would need a masked LayerNorm over the padded lanes.
    assert P % 128 == 0, "projection_dim must be a multiple of 128 for lane-dense stores"

    wf, bf = params["wf"], params["bf"]
    hp = lax.Precision.HIGHEST                # hoisted matmuls at full f32 precision

    ws_f = jnp.dot(params["ws"], wf, precision=hp)            # (S, P)
    wa_f = jnp.dot(params["wa"], wf, precision=hp)            # (A, P)
    wr_f = jnp.dot(params["wr"], wf, precision=hp)            # (1, P)
    tab_f = jnp.dot(params["time_table"], wf, precision=hp)   # (E, P)

    consts = jnp.concatenate([
        jnp.dot(params["br"], wf, precision=hp) + bf,
        jnp.dot(params["bs"], wf, precision=hp) + bf,
        jnp.dot(params["ba"], wf, precision=hp) + bf,
        params["gamma"],
        params["beta"],
    ], axis=0)                                                 # (5, P)

    E_pad = _round_up(E, 8)
    if E_pad != E:
        tab_f = jnp.pad(tab_f, ((0, E_pad - E), (0, 0)))

    # Flatten (B, T) -> rows; contiguous reshapes are free views.
    s2 = states.reshape(rows, S).astype(jnp.float32)
    a2 = actions.reshape(rows, A).astype(jnp.float32)
    r2 = returns_to_go.reshape(rows, 1).astype(jnp.float32)
    t2 = timesteps.reshape(rows, 1).astype(jnp.int32)

    # ---- tile selection ------------------------------------------------------
    # Cap the tile by a conservative double-buffered per-step VMEM budget so the
    # same tile fits v7x (64 MiB physical) and v5e's smaller scoped default.
    per_row_bytes = 4 * (S + A + 2 + P3)
    tile_cap = max(8, ((24 << 20) // (2 * per_row_bytes)) // 8 * 8)
    eff_max_tile = min(max_tile, tile_cap)

    # Equalized blocks (waste <= 7 rows) and >= 2 grid steps when rows allow,
    # so dimension_semantics=("parallel",) can shard rows across both v7x TCs.
    steps = max(-(-rows // eff_max_tile), min(2, -(-rows // 8)), 1)
    tile = _round_up(-(-rows // steps), 8)
    padded = _round_up(rows, tile)
    grid = padded // tile

    if padded != rows:
        pad = padded - rows
        s2 = jnp.pad(s2, ((0, pad), (0, 0)))
        a2 = jnp.pad(a2, ((0, pad), (0, 0)))
        r2 = jnp.pad(r2, ((0, pad), (0, 0)))
        t2 = jnp.pad(t2, ((0, pad), (0, 0)))

    grid_spec = pltpu.PrefetchScalarGridSpec(
        num_scalar_prefetch=0,
        grid=(grid,),
        in_specs=[
            pl.BlockSpec((tile, S), lambda i: (i, 0)),         # states
            pl.BlockSpec((tile, A), lambda i: (i, 0)),         # actions
            pl.BlockSpec((tile, 1), lambda i: (i, 0)),         # returns_to_go
            pl.BlockSpec((tile, 1), lambda i: (i, 0)),         # timesteps (int32)
            pl.BlockSpec((S, P), lambda i: (0, 0)),            # Ws@Wf (grid-invariant)
            pl.BlockSpec((A, P), lambda i: (0, 0)),            # Wa@Wf
            pl.BlockSpec((1, P), lambda i: (0, 0)),            # Wr@Wf
            pl.BlockSpec((E_pad, P), lambda i: (0, 0)),        # projected time table
            pl.BlockSpec((5, P), lambda i: (0, 0)),            # biases / gamma / beta
        ],
        out_specs=pl.BlockSpec((tile, P3), lambda i: (i, 0)),
    )

    # Explicit VMEM limit from the actual footprint (double-buffered streams +
    # resident constants + in-kernel intermediates), with headroom.
    stream_bytes = 2 * 4 * (tile * (S + A + 2) + tile * P3)
    const_bytes = 2 * 4 * (S + A + 1 + E_pad + 5) * P
    scratch_bytes = 3 * 4 * tile * P + (4 << 20)
    vmem_limit = int(min(max(stream_bytes + const_bytes + scratch_bytes, 16 << 20),
                         112 << 20))

    cost = pl.CostEstimate(
        flops=2 * padded * P * (S + A + 1 + E_pad) + 10 * padded * P3,
        transcendentals=3 * padded,
        bytes_accessed=4 * (padded * (S + A + 2) + padded * P3
                            + (S + A + 1 + E_pad + 5) * P),
    )

    out = pl.pallas_call(
        _rsa_fused_kernel,
        out_shape=jax.ShapeDtypeStruct((padded, P3), jnp.float32),
        grid_spec=grid_spec,
        compiler_params=pltpu.CompilerParams(
            dimension_semantics=("parallel",),
            vmem_limit_bytes=vmem_limit),
        cost_estimate=cost,
    )(s2, a2, r2, t2, ws_f, wa_f, wr_f, tab_f, consts)

    # (rows, 3P) row-major == (B, T, 3, P) == (B, 3T, P): free contiguous view.
    return out[:rows].reshape(B, 3 * T, P)


def rsa_reference(states, actions, returns_to_go, timesteps, params):
    """Pure-JAX reference mirroring the PyTorch forward exactly."""
    B, T, _ = states.shape
    temb = jnp.take(params["time_table"], timesteps, axis=0)
    se = states @ params["ws"] + params["bs"][0] + temb
    ae = actions @ params["wa"] + params["ba"][0] + temb
    re = returns_to_go @ params["wr"] + params["br"][0] + temb
    stacked = jnp.stack([re, se, ae], axis=1)                     # (B, 3, T, H)
    stacked = jnp.transpose(stacked, (0, 2, 1, 3)).reshape(B, 3 * T, -1)
    f = stacked @ params["wf"] + params["bf"][0]
    mean = jnp.mean(f, axis=-1, keepdims=True)
    var = jnp.mean((f - mean) ** 2, axis=-1, keepdims=True)
    return (f - mean) / jnp.sqrt(var + 1e-12) * params["gamma"][0] + params["beta"][0]


def make_params(key, state_dim, act_dim, hidden_size, projection_dim, max_ep_len):
    ks = jax.random.split(key, 8)
    sc = 0.02
    return {
        "time_table": sc * jax.random.normal(ks[0], (max_ep_len, hidden_size), jnp.float32),
        "ws": sc * jax.random.normal(ks[1], (state_dim, hidden_size), jnp.float32),
        "bs": sc * jax.random.normal(ks[2], (1, hidden_size), jnp.float32),
        "wa": sc * jax.random.normal(ks[3], (act_dim, hidden_size), jnp.float32),
        "ba": sc * jax.random.normal(ks[4], (1, hidden_size), jnp.float32),
        "wr": sc * jax.random.normal(ks[5], (1, hidden_size), jnp.float32),
        "br": sc * jax.random.normal(ks[6], (1, hidden_size), jnp.float32),
        "wf": sc * jax.random.normal(ks[7], (hidden_size, projection_dim), jnp.float32),
        "bf": jnp.zeros((1, projection_dim), jnp.float32),
        "gamma": jnp.ones((1, projection_dim), jnp.float32),
        "beta": jnp.zeros((1, projection_dim), jnp.float32),
    }


if __name__ == "__main__":
    B, T = 2, 8
    STATE_DIM, ACT_DIM, HIDDEN, PROJ, MAX_EP_LEN = 16, 8, 32, 128, 64

    key = jax.random.PRNGKey(0)
    k_p, k_s, k_a, k_r, k_g, k_t = jax.random.split(key, 6)

    params = make_params(k_p, STATE_DIM, ACT_DIM, HIDDEN, PROJ, MAX_EP_LEN)

    states = jax.random.normal(k_s, (B, T, STATE_DIM), jnp.float32)
    actions = jax.random.normal(k_a, (B, T, ACT_DIM), jnp.float32)
    rewards = jax.random.normal(k_r, (B, T, 1), jnp.float32)
    returns_to_go = jax.random.normal(k_g, (B, T, 1), jnp.float32)
    timesteps = jax.random.randint(k_t, (B, T), 0, MAX_EP_LEN, jnp.int32)

    out = rsa_embeddings(states, actions, rewards, returns_to_go, timesteps, params)
    out = jax.block_until_ready(out)

    ref = rsa_reference(states, actions, returns_to_go, timesteps, params)
    assert out.shape == (B, 3 * T, PROJ), out.shape
    assert jnp.allclose(out, ref, atol=1e-4, rtol=1e-4), float(jnp.max(jnp.abs(out - ref)))

    print("KERNEL_OK")
</pallas_src>

<mosaic_0001>
module attributes {stable_mosaic.version = 11 : i64} {
  func.func @_rsa_fused_kernel(%arg0: i32, %arg1: memref<8x16xf32, #tpu.memory_space<vmem>>, %arg2: memref<8x8xf32, #tpu.memory_space<vmem>>, %arg3: memref<8x1xf32, #tpu.memory_space<vmem>>, %arg4: memref<8x1xi32, #tpu.memory_space<vmem>>, %arg5: memref<16x128xf32, #tpu.memory_space<vmem>>, %arg6: memref<8x128xf32, #tpu.memory_space<vmem>>, %arg7: memref<1x128xf32, #tpu.memory_space<vmem>>, %arg8: memref<64x128xf32, #tpu.memory_space<vmem>>, %arg9: memref<5x128xf32, #tpu.memory_space<vmem>>, %arg10: memref<8x384xf32, #tpu.memory_space<vmem>>) attributes {dimension_semantics = [#tpu.dimension_semantics<parallel>], iteration_bounds = array<i64: 2>, scalar_prefetch = 0 : i64, scratch_operands = 0 : i64, tpu.core_type = #tpu.core_type<tc>, window_params = [{transform_indices = @transform_0, window_bounds = array<i64: 8, 16>}, {transform_indices = @transform_1, window_bounds = array<i64: 8, 8>}, {transform_indices = @transform_2, window_bounds = array<i64: 8, 1>}, {transform_indices = @transform_3, window_bounds = array<i64: 8, 1>}, {pipeline_mode = #tpu.pipeline_mode<synchronous>, transform_indices = @transform_4, window_bounds = array<i64: 16, 128>}, {pipeline_mode = #tpu.pipeline_mode<synchronous>, transform_indices = @transform_5, window_bounds = array<i64: 8, 128>}, {pipeline_mode = #tpu.pipeline_mode<synchronous>, transform_indices = @transform_6, window_bounds = array<i64: 1, 128>}, {pipeline_mode = #tpu.pipeline_mode<synchronous>, transform_indices = @transform_7, window_bounds = array<i64: 64, 128>}, {pipeline_mode = #tpu.pipeline_mode<synchronous>, transform_indices = @transform_8, window_bounds = array<i64: 5, 128>}, {transform_indices = @transform_9, window_bounds = array<i64: 8, 384>}]} {
    %c0 = arith.constant 0 : index
    %c0_0 = arith.constant 0 : index
    %0 = vector.load %arg4[%c0, %c0_0] : memref<8x1xi32, #tpu.memory_space<vmem>>, vector<8x1xi32>
    %cst = arith.constant 0.000000e+00 : f32
    %1 = vector.broadcast %cst : f32 to vector<8x128xf32>
    %2 = tpu.iota {dimensions = array<i32: 1>} : vector<8x64xi32>
    %c0_i32 = arith.constant 0 : i32
    %3 = vector.broadcast %c0_i32 : i32 to vector<8x64xi32>
    %4 = arith.addi %2, %3 : vector<8x64xi32>
    %5 = vector.broadcast %0 : vector<8x1xi32> to vector<8x64xi32>
    %6 = arith.cmpi eq, %5, %4 : vector<8x64xi32>
    %7 = arith.extui %6 : vector<8x64xi1> to vector<8x64xi32>
    %8 = arith.sitofp %7 : vector<8x64xi32> to vector<8x64xf32>
    %c0_1 = arith.constant 0 : index
    %c0_2 = arith.constant 0 : index
    %9 = vector.load %arg8[%c0_1, %c0_2] : memref<64x128xf32, #tpu.memory_space<vmem>>, vector<64x128xf32>
    %cst_3 = arith.constant dense<0.000000e+00> : vector<8x128xf32>
    %10 = tpu.matmul %8, %9, %cst_3 {dimension_numbers = #tpu.dot_dimension_numbers<[1], [0], [0], [1], [0, 0, 1, 1], [], []>} : vector<8x64xf32>, vector<64x128xf32>, vector<8x128xf32> -> vector<8x128xf32>
    %11 = arith.addf %1, %10 : vector<8x128xf32>
    %c3 = arith.constant 3 : index
    %c0_4 = arith.constant 0 : index
    %12 = vector.load %arg9[%c3, %c0_4] : memref<5x128xf32, #tpu.memory_space<vmem>>, vector<1x128xf32>
    %c4 = arith.constant 4 : index
    %c0_5 = arith.constant 0 : index
    %13 = vector.load %arg9[%c4, %c0_5] : memref<5x128xf32, #tpu.memory_space<vmem>>, vector<1x128xf32>
    %c0_6 = arith.constant 0 : index
    %c0_7 = arith.constant 0 : index
    %14 = vector.load %arg3[%c0_6, %c0_7] : memref<8x1xf32, #tpu.memory_space<vmem>>, vector<8x1xf32>
    %c0_8 = arith.constant 0 : index
    %c0_9 = arith.constant 0 : index
    %15 = vector.load %arg7[%c0_8, %c0_9] : memref<1x128xf32, #tpu.memory_space<vmem>>, vector<1x128xf32>
    %16 = vector.broadcast %14 : vector<8x1xf32> to vector<8x128xf32>
    %17 = vector.broadcast %15 : vector<1x128xf32> to vector<8x128xf32>
    %18 = arith.mulf %16, %17 : vector<8x128xf32>
    %c0_10 = arith.constant 0 : index
    %c0_11 = arith.constant 0 : index
    %19 = vector.load %arg9[%c0_10, %c0_11] : memref<5x128xf32, #tpu.memory_space<vmem>>, vector<1x128xf32>
    %20 = vector.broadcast %19 : vector<1x128xf32> to vector<8x128xf32>
    %21 = arith.addf %18, %20 : vector<8x128xf32>
    %22 = arith.addf %21, %11 : vector<8x128xf32>
    %cst_12 = arith.constant dense<0.000000e+00> : vector<8xf32>
    %23 = vector.multi_reduction <add>, %22, %cst_12 [1] : vector<8x128xf32> to vector<8xf32>
    %24 = vector.shape_cast %23 : vector<8xf32> to vector<8x1xf32>
    %cst_13 = arith.constant 1.280000e+02 : f32
    %25 = vector.broadcast %cst_13 : f32 to vector<8x1xf32>
    %26 = arith.divf %24, %25 : vector<8x1xf32>
    %27 = vector.broadcast %26 : vector<8x1xf32> to vector<8x128xf32>
    %28 = arith.subf %22, %27 : vector<8x128xf32>
    %29 = arith.mulf %28, %28 : vector<8x128xf32>
    %cst_14 = arith.constant dense<0.000000e+00> : vector<8xf32>
    %30 = vector.multi_reduction <add>, %29, %cst_14 [1] : vector<8x128xf32> to vector<8xf32>
    %31 = vector.shape_cast %30 : vector<8xf32> to vector<8x1xf32>
    %cst_15 = arith.constant 1.280000e+02 : f32
    %32 = vector.broadcast %cst_15 : f32 to vector<8x1xf32>
    %33 = arith.divf %31, %32 : vector<8x1xf32>
    %cst_16 = arith.constant 9.99999996E-13 : f32
    %34 = vector.broadcast %cst_16 : f32 to vector<8x1xf32>
    %35 = arith.addf %33, %34 : vector<8x1xf32>
    %36 = math.rsqrt %35 : vector<8x1xf32>
    %37 = vector.broadcast %36 : vector<8x1xf32> to vector<8x128xf32>
    %38 = arith.mulf %28, %37 : vector<8x128xf32>
    %39 = vector.broadcast %12 : vector<1x128xf32> to vector<8x128xf32>
    %40 = arith.mulf %38, %39 : vector<8x128xf32>
    %41 = vector.broadcast %13 : vector<1x128xf32> to vector<8x128xf32>
    %42 = arith.addf %40, %41 : vector<8x128xf32>
    %c0_17 = arith.constant 0 : index
    %c0_18 = arith.constant 0 : index
    %43 = vector.load %arg10[%c0_17, %c0_18] : memref<8x384xf32, #tpu.memory_space<vmem>>, vector<8x128xf32>
    tpu.vector_store %arg10[%c0_17, %c0_18], %42 {strides = array<i32>} : memref<8x384xf32, #tpu.memory_space<vmem>>, vector<8x128xf32>,
    %c0_19 = arith.constant 0 : index
    %c0_20 = arith.constant 0 : index
    %44 = vector.load %arg1[%c0_19, %c0_20] : memref<8x16xf32, #tpu.memory_space<vmem>>, vector<8x16xf32>
    %c0_21 = arith.constant 0 : index
    %c0_22 = arith.constant 0 : index
    %45 = vector.load %arg5[%c0_21, %c0_22] : memref<16x128xf32, #tpu.memory_space<vmem>>, vector<16x128xf32>
    %cst_23 = arith.constant dense<0.000000e+00> : vector<8x128xf32>
    %46 = tpu.matmul %44, %45, %cst_23 {dimension_numbers = #tpu.dot_dimension_numbers<[1], [0], [0], [1], [0, 0, 1, 1], [], []>} : vector<8x16xf32>, vector<16x128xf32>, vector<8x128xf32> -> vector<8x128xf32>
    %c1 = arith.constant 1 : index
    %c0_24 = arith.constant 0 : index
    %47 = vector.load %arg9[%c1, %c0_24] : memref<5x128xf32, #tpu.memory_space<vmem>>, vector<1x128xf32>
    %48 = vector.broadcast %47 : vector<1x128xf32> to vector<8x128xf32>
    %49 = arith.addf %46, %48 : vector<8x128xf32>
    %50 = arith.addf %49, %11 : vector<8x128xf32>
    %cst_25 = arith.constant dense<0.000000e+00> : vector<8xf32>
    %51 = vector.multi_reduction <add>, %50, %cst_25 [1] : vector<8x128xf32> to vector<8xf32>
    %52 = vector.shape_cast %51 : vector<8xf32> to vector<8x1xf32>
    %cst_26 = arith.constant 1.280000e+02 : f32
    %53 = vector.broadcast %cst_26 : f32 to vector<8x1xf32>
    %54 = arith.divf %52, %53 : vector<8x1xf32>
    %55 = vector.broadcast %54 : vector<8x1xf32> to vector<8x128xf32>
    %56 = arith.subf %50, %55 : vector<8x128xf32>
    %57 = arith.mulf %56, %56 : vector<8x128xf32>
    %cst_27 = arith.constant dense<0.000000e+00> : vector<8xf32>
    %58 = vector.multi_reduction <add>, %57, %cst_27 [1] : vector<8x128xf32> to vector<8xf32>
    %59 = vector.shape_cast %58 : vector<8xf32> to vector<8x1xf32>
    %cst_28 = arith.constant 1.280000e+02 : f32
    %60 = vector.broadcast %cst_28 : f32 to vector<8x1xf32>
    %61 = arith.divf %59, %60 : vector<8x1xf32>
    %cst_29 = arith.constant 9.99999996E-13 : f32
    %62 = vector.broadcast %cst_29 : f32 to vector<8x1xf32>
    %63 = arith.addf %61, %62 : vector<8x1xf32>
    %64 = math.rsqrt %63 : vector<8x1xf32>
    %65 = vector.broadcast %64 : vector<8x1xf32> to vector<8x128xf32>
    %66 = arith.mulf %56, %65 : vector<8x128xf32>
    %67 = vector.broadcast %12 : vector<1x128xf32> to vector<8x128xf32>
    %68 = arith.mulf %66, %67 : vector<8x128xf32>
    %69 = vector.broadcast %13 : vector<1x128xf32> to vector<8x128xf32>
    %70 = arith.addf %68, %69 : vector<8x128xf32>
    %c0_30 = arith.constant 0 : index
    %c128 = arith.constant 128 : index
    %71 = vector.load %arg10[%c0_30, %c128] : memref<8x384xf32, #tpu.memory_space<vmem>>, vector<8x128xf32>
    tpu.vector_store %arg10[%c0_30, %c128], %70 {strides = array<i32>} : memref<8x384xf32, #tpu.memory_space<vmem>>, vector<8x128xf32>,
    %c0_31 = arith.constant 0 : index
    %c0_32 = arith.constant 0 : index
    %72 = vector.load %arg2[%c0_31, %c0_32] : memref<8x8xf32, #tpu.memory_space<vmem>>, vector<8x8xf32>
    %c0_33 = arith.constant 0 : index
    %c0_34 = arith.constant 0 : index
    %73 = vector.load %arg6[%c0_33, %c0_34] : memref<8x128xf32, #tpu.memory_space<vmem>>, vector<8x128xf32>
    %cst_35 = arith.constant dense<0.000000e+00> : vector<8x128xf32>
    %74 = tpu.matmul %72, %73, %cst_35 {dimension_numbers = #tpu.dot_dimension_numbers<[1], [0], [0], [1], [0, 0, 1, 1], [], []>} : vector<8x8xf32>, vector<8x128xf32>, vector<8x128xf32> -> vector<8x128xf32>
    %c2 = arith.constant 2 : index
    %c0_36 = arith.constant 0 : index
    %75 = vector.load %arg9[%c2, %c0_36] : memref<5x128xf32, #tpu.memory_space<vmem>>, vector<1x128xf32>
    %76 = vector.broadcast %75 : vector<1x128xf32> to vector<8x128xf32>
    %77 = arith.addf %74, %76 : vector<8x128xf32>
    %78 = arith.addf %77, %11 : vector<8x128xf32>
    %cst_37 = arith.constant dense<0.000000e+00> : vector<8xf32>
    %79 = vector.multi_reduction <add>, %78, %cst_37 [1] : vector<8x128xf32> to vector<8xf32>
    %80 = vector.shape_cast %79 : vector<8xf32> to vector<8x1xf32>
    %cst_38 = arith.constant 1.280000e+02 : f32
    %81 = vector.broadcast %cst_38 : f32 to vector<8x1xf32>
    %82 = arith.divf %80, %81 : vector<8x1xf32>
    %83 = vector.broadcast %82 : vector<8x1xf32> to vector<8x128xf32>
    %84 = arith.subf %78, %83 : vector<8x128xf32>
    %85 = arith.mulf %84, %84 : vector<8x128xf32>
    %cst_39 = arith.constant dense<0.000000e+00> : vector<8xf32>
    %86 = vector.multi_reduction <add>, %85, %cst_39 [1] : vector<8x128xf32> to vector<8xf32>
    %87 = vector.shape_cast %86 : vector<8xf32> to vector<8x1xf32>
    %cst_40 = arith.constant 1.280000e+02 : f32
    %88 = vector.broadcast %cst_40 : f32 to vector<8x1xf32>
    %89 = arith.divf %87, %88 : vector<8x1xf32>
    %cst_41 = arith.constant 9.99999996E-13 : f32
    %90 = vector.broadcast %cst_41 : f32 to vector<8x1xf32>
    %91 = arith.addf %89, %90 : vector<8x1xf32>
    %92 = math.rsqrt %91 : vector<8x1xf32>
    %93 = vector.broadcast %92 : vector<8x1xf32> to vector<8x128xf32>
    %94 = arith.mulf %84, %93 : vector<8x128xf32>
    %95 = vector.broadcast %12 : vector<1x128xf32> to vector<8x128xf32>
    %96 = arith.mulf %94, %95 : vector<8x128xf32>
    %97 = vector.broadcast %13 : vector<1x128xf32> to vector<8x128xf32>
    %98 = arith.addf %96, %97 : vector<8x128xf32>
    %c0_42 = arith.constant 0 : index
    %c256 = arith.constant 256 : index
    %99 = vector.load %arg10[%c0_42, %c256] : memref<8x384xf32, #tpu.memory_space<vmem>>, vector<8x128xf32>
    tpu.vector_store %arg10[%c0_42, %c256], %98 {strides = array<i32>} : memref<8x384xf32, #tpu.memory_space<vmem>>, vector<8x128xf32>,
    return
  }
  func.func @transform_0(%arg0: i32) -> (i32, i32) {
    %c0_i32 = arith.constant 0 : i32
    %c0_i32_0 = arith.constant 0 : i32
    return %arg0, %c0_i32 : i32, i32
  }
  func.func @transform_1(%arg0: i32) -> (i32, i32) {
    %c0_i32 = arith.constant 0 : i32
    %c0_i32_0 = arith.constant 0 : i32
    return %arg0, %c0_i32 : i32, i32
  }
  func.func @transform_2(%arg0: i32) -> (i32, i32) {
    %c0_i32 = arith.constant 0 : i32
    %c0_i32_0 = arith.constant 0 : i32
    return %arg0, %c0_i32 : i32, i32
  }
  func.func @transform_3(%arg0: i32) -> (i32, i32) {
    %c0_i32 = arith.constant 0 : i32
    %c0_i32_0 = arith.constant 0 : i32
    return %arg0, %c0_i32 : i32, i32
  }
  func.func @transform_4(%arg0: i32) -> (i32, i32) {
    %c0_i32 = arith.constant 0 : i32
    %c0_i32_0 = arith.constant 0 : i32
    %c0_i32_1 = arith.constant 0 : i32
    return %c0_i32, %c0_i32_0 : i32, i32
  }
  func.func @transform_5(%arg0: i32) -> (i32, i32) {
    %c0_i32 = arith.constant 0 : i32
    %c0_i32_0 = arith.constant 0 : i32
    %c0_i32_1 = arith.constant 0 : i32
    return %c0_i32, %c0_i32_0 : i32, i32
  }
  func.func @transform_6(%arg0: i32) -> (i32, i32) {
    %c0_i32 = arith.constant 0 : i32
    %c0_i32_0 = arith.constant 0 : i32
    %c0_i32_1 = arith.constant 0 : i32
    return %c0_i32, %c0_i32_0 : i32, i32
  }
  func.func @transform_7(%arg0: i32) -> (i32, i32) {
    %c0_i32 = arith.constant 0 : i32
    %c0_i32_0 = arith.constant 0 : i32
    %c0_i32_1 = arith.constant 0 : i32
    return %c0_i32, %c0_i32_0 : i32, i32
  }
  func.func @transform_8(%arg0: i32) -> (i32, i32) {
    %c0_i32 = arith.constant 0 : i32
    %c0_i32_0 = arith.constant 0 : i32
    %c0_i32_1 = arith.constant 0 : i32
    return %c0_i32, %c0_i32_0 : i32, i32
  }
  func.func @transform_9(%arg0: i32) -> (i32, i32) {
    %c0_i32 = arith.constant 0 : i32
    %c0_i32_0 = arith.constant 0 : i32
    return %arg0, %c0_i32 : i32, i32
  }
}

</mosaic_0001>

<bundles_post_ra>
// kernel: rsa_embeddings.1
= control target key start
LH: loop header
LB: loop body
LE: loop exit
PB: predicated region body
PF: predicated region fallthrough
CT: control target
= control target key end

     0   :  { %s966_s30 = smov 0   ;;  %s1050_s0 = inlined_call_operand.vmem [shape: f32[16,16], index: 0, kind: input, shape index: {}]   ;;  %s1051_s1 = inlined_call_operand.vmem [shape: f32[16,8], index: 1, kind: input, shape index: {}]   ;;  %s1052_s2 = inlined_call_operand.vmem [shape: f32[16,1], index: 2, kind: input, shape index: {}]   ;;  %s1053_s3 = inlined_call_operand.vmem [shape: s32[16,1], index: 3, kind: input, shape index: {}]   ;;  %s1054_s4 = inlined_call_operand.vmem [shape: f32[16,128], index: 4, kind: input, shape index: {}]   ;;  %s1055_s5 = inlined_call_operand.vmem [shape: f32[8,128], index: 5, kind: input, shape index: {}]   ;;  %s1056_s6 = inlined_call_operand.vmem [shape: f32[1,128], index: 6, kind: input, shape index: {}]   ;;  %s1057_s7 = inlined_call_operand.vmem [shape: f32[64,128], index: 7, kind: input, shape index: {}]   ;;  %s1058_s8 = inlined_call_operand.vmem [shape: f32[5,128], index: 8, kind: input, shape index: {}]   ;;  %s1059_s9 = inlined_call_operand.vmem [shape: f32[16,384], index: 9, kind: output, shape index: {}]  }
   0x1 LB: > { %s802_s10 = sadd.s32 4294967295, %s910_s30   ;;  %p806_p0 = scmp.ge.s32.totalorder %s910_s30, 1  ;;  %s910_s30 = sphi %s966_s30, %s19_s30  }
   0x2   : > { %p313_p1 = scmp.lt.s32.totalorder %s910_s30, 3 }
   0x4   : > { %p314_p2 = pnand %p806_p0, %p313_p1 }
   0x5   : > { %p360_p3 = scmp.lt.s32.totalorder (!%p314_p2), %s802_s10, 1  ;;  %v390_v0 = vld [vmem:[%s1057_s7] sm:$0xff] (!%p314_p2)  ;;  %v391_v1 = vld [vmem:[%s1057_s7 + $0x8] sm:$0xff] (!%p314_p2)  ;;  %v392_v2 = vld [vmem:[%s1057_s7 + $0x10] sm:$0xff] (!%p314_p2)  ;;  %v912_v3 = vmov (!%p314_p2), 0   ;;  %v913_v4 = vmov (!%p314_p2), 0.0|0.0   ;;  %v382_v23 = vlaneseq (!%p314_p2) }
   0x6   : > { %317 = sbr.rel (%p314_p2) target bundleno = 681 (0x2a9), region = 56  ;;  %897 = vset.pattern.permute.xlu0 (!%p314_p2), %v912_v3  ;;  %869 = vmatprep.subr.bf16.mxu0 (!%p314_p2), %v913_v4  ;;  %v870_v5 = vpack.c.bf16 (!%p314_p2), %v391_v1, %v390_v0  ;;  %v393_v6 = vld [vmem:[%s1057_s7 + $0x18] sm:$0xff] (!%p314_p2)  ;;  %v519_v7 = vld [vmem:[%s1054_s4] sm:$0xff] (!%p314_p2)  ;;  %v520_v8 = vld [vmem:[%s1054_s4 + $0x8] sm:$0xff] (!%p314_p2)  ;;  %vm914_vm0 = vmmov (!%p314_p2), 0   ;;  %v915_v10 = vmov (!%p314_p2), 0.0  }
   0x7   : > { %881 = vmatprep.subr.bf16.mxu1 (!%p314_p2), %v913_v4  ;;  %v882_v9 = vpack.c.bf16 (!%p314_p2), %v520_v8, %v519_v7  ;;  %861 = vmatprep.mubr.msk.f32.mxu1 (!%p314_p2), %vm914_vm0, %v915_v10  ;;  %v873_v11 = vpack.c.bf16 (!%p314_p2), %v393_v6, %v392_v2  ;;  %v394_v12 = vld [vmem:[%s1057_s7 + $0x20] sm:$0xff] (!%p314_p2)  ;;  %v395_v13 = vld [vmem:[%s1057_s7 + $0x28] sm:$0xff] (!%p314_p2)  ;;  %vm526_vm1 = vcmask (!%p314_p2), 130048   ;;  %v396_v19 = vld [vmem:[%s1057_s7 + $0x30] sm:$0xff] (!%p314_p2)  ;;  %vm622_vm2 = vcmask (!%p314_p2), 64512  }
   0x8   : > { %871 = vmatpush3.bf16.msra.mxu0 (!%p314_p2), %v870_v5  ;;  %854 = vmatprep.mubr.msk.f32.mxu0 (!%p314_p2), %vm914_vm0, %v915_v10  ;;  %v616_v15 = vld [vmem:[%s1055_s5] sm:$0xff] (!%p314_p2)  ;;  %v876_v16 = vpack.c.bf16 (!%p314_p2), %v395_v13, %v394_v12  ;;  %v397_v20 = vld [vmem:[%s1057_s7 + $0x38] sm:$0xff] (!%p314_p2)  ;;  %v383_v24 = vand.u32 (!%p314_p2), 127, %v382_v23  ;;  %vm398_vm3 = vcmask (!%p314_p2), 523264  }
   0x9   : > { %872 = vmatprep.subr.bf16.mxu0 (!%p314_p2), %v913_v4  ;;  %883 = vmatpush3.bf16.msra.mxu1 (!%p314_p2), %v882_v9  ;;  %v879_v22 = vpack.c.bf16 (!%p314_p2), %v397_v20, %v396_v19  ;;  %v814_v31 = vld [vmem:[%s1056_s6] ss:$0 sm:$0xff] (!%p314_p2)  ;;  %v818_v33 = vld [vmem:[%s1058_s8 + $0x1] ss:$0 sm:$0xff] (!%p314_p2)  ;;  %v820_v34 = vld [vmem:[%s1058_s8 + $0x2] ss:$0 sm:$0xff] (!%p314_p2) }
   0xa   : > { %864 = vmatprep.subr.mxu1 (!%p314_p2), %v915_v10  ;;  %v815_v36 = vld [vmem:[%s1058_s8] ss:$0 sm:$0xff] (!%p314_p2)  ;;  %v816_v3 = vld [vmem:[%s1058_s8 + $0x3] ss:$0 sm:$0xff] (!%p314_p2)  ;;  %v817_v5 = vld [vmem:[%s1058_s8 + $0x4] ss:$0 sm:$0xff] (!%p314_p2) }
   0xc   : > { %874 = vmatpush3.bf16.msra.mxu0 (!%p314_p2), %v873_v11 }
   0xd   : > { %s1061_s10 = smov (!%p360_p3, %s802_s10), 1  ;;  %875 = vmatprep.subr.bf16.mxu0 %v913_v4 }
   0xe   : > { %s807_s23 = sshll.u32 %s1061_s10, 3  ;;  %s884_s16 = smul.u32 24, %s1061_s10 }
   0xf   : > { %s375_s11 = scalar_lea.vmem %s1053_s3, %s807_s23  ;;  %s371_s14 = scalar_lea.vmem %s1052_s2, %s807_s23 }
  0x10   : > { %v381_v14 = vld [vmem:[%s375_s11] sm:$0xff]  ;;  %s363_s17 = scalar_lea.vmem %s1050_s0, %s807_s23  ;;  %s367_s22 = scalar_lea.vmem %s1051_s1, %s807_s23  ;;  %877 = vmatpush3.bf16.msra.mxu0 %v876_v16 }
  0x11   : > { %385 = vperm.xlu0 %897, %v381_v14   ;;  %v518_v17 = vld [vmem:[%s363_s17] sm:$0xff]  ;;  %878 = vmatprep.subr.bf16.mxu0 %v913_v4  ;;  %s380_s24 = scalar_lea.vmem %s1059_s9, %s884_s16 }
  0x12   : > { %v474_v18 = vld [vmem:[%s371_s14] sm:$0xff]  ;;  %862 = vmatmul.mubr.msk.f32.vlgmr.msra.gmra.mrb[0].mxu1 %vm526_vm1, %v518_v17 }
  0x13   : > { %865 = vmatpush3.msra.mxu1 %v616_v15  ;;  %866 = vmatprep.mubr.msk.f32.mxu1 %vm914_vm0, %v915_v10  ;;  %v615_v21 = vld [vmem:[%s367_s22] sm:$0xff] }
  0x14   : > { %880 = vmatpush3.bf16.msra.mxu0 %v879_v22 }
  0x15   : > { %478 = vperm.xlu0 %897, %v474_v18  }
  0x16   : > { %867 = vmatmul.mubr.msk.f32.vlgmr.msra.gmra.mrb[2].mxu1 %vm622_vm2, %v615_v21 }
  0x90   : > { %v386_v25 = vpop.permute.xlu0 %385 }
  0x91   : > { %vm387_vm4 = vcmp.eq.s32.totalorder %v386_v25, %v383_v24 }
  0x92   : > { %v812_v26 = vsel %vm387_vm4, 1.0, %v915_v10 }
  0x93   : > { %855 = vmatmul.mubr.msk.f32.vlgmr.msra.gmra.mrb[0].mxu0 %vm398_vm3, %v812_v26 }
  0x94   : > { %v479_v32 = vpop.permute.xlu0 %478 }
  0x95   : > { %v487_v35 = vmul.f32 %v814_v31, %v479_v32 }
  0x97   : > { %v493_v39 = vadd.f32 %v815_v36, %v487_v35 }
  0xe5   : > { %v596_v27 = vpop.f32.mrb[0].mxu1 }
  0xe6   : > { %v863_v28 = vpop.f32.mrb[1].mxu1  ;;  %v597_v37 = vadd.f32 %v818_v33, %v596_v27 }
  0xe9   : > { %v692_v29 = vpop.f32.mrb[2].mxu1 }
  0xea   : > { %v868_v30 = vpop.f32.mrb[3].mxu1  ;;  %v693_v38 = vadd.f32 %v820_v34, %v692_v29 }
 0x166   : > { %v468_v40 = vpop.f32.mrb[0].mxu0 }
 0x167   : > { %v856_v41 = vpop.f32.mrb[1].mxu0  ;;  %v494_v42 = vadd.f32 %v493_v39, %v468_v40  ;;  %v696_v43 = vadd.f32 %v693_v38, %v468_v40  ;;  %v600_v44 = vadd.f32 %v597_v37, %v468_v40 }
 0x169   : > { %495 = vadd.xlane.f32.xlu1 %v494_v42  ;;  %697 = vadd.xlane.f32.xlu0 %v696_v43 }
 0x16d   : > { %601 = vadd.xlane.f32.xlu1 %v600_v44 }
 0x1f6   : > { %v496_v45 = vpop.xlane.xlu1 %495  ;;  %v698_v47 = vpop.xlane.xlu0 %697 }
 0x1f7   : > { %v498_v46 = vmul.f32 0.0078125, %v496_v45  ;;  %v699_v50 = vmul.f32 0.0078125, %v698_v47 }
 0x1f9   : > { %v499_v48 = vsub.f32 %v494_v42, %v498_v46  ;;  %v700_v54 = vsub.f32 %v696_v43, %v699_v50 }
 0x1fa   : > { %v602_v49 = vpop.xlane.xlu1 %601 }
 0x1fb   : > { %v603_v51 = vmul.f32 0.0078125, %v602_v49  ;;  %v500_v52 = vmul.f32 %v499_v48, %v499_v48  ;;  %v701_v56 = vmul.f32 %v700_v54, %v700_v54 }
 0x1fd   : > { %v604_v53 = vsub.f32 %v600_v44, %v603_v51  ;;  %501 = vadd.xlane.f32.xlu1 %v500_v52 }
 0x1ff   : > { %v605_v55 = vmul.f32 %v604_v53, %v604_v53 }
 0x201   : > { %606 = vadd.xlane.f32.xlu1 %v605_v55 }
 0x205   : > { %702 = vadd.xlane.f32.xlu1 %v701_v56 }
 0x28a   : > { %v502_v57 = vpop.xlane.xlu1 %501 }
 0x28b   : > { %v503_v58 = vmul.f32 0.0078125, %v502_v57 }
 0x28d   : > { %v504_v59 = vadd.f32 1e-12, %v503_v58 }
 0x28e   : > { %v607_v60 = vpop.xlane.xlu1 %606 }
 0x28f   : > { %898 = vrsqrt.f32 %v504_v59  ;;  %v608_v61 = vmul.f32 0.0078125, %v607_v60 }
 0x291   : > { %v609_v62 = vadd.f32 1e-12, %v608_v61 }
 0x292   : > { %v703_v63 = vpop.xlane.xlu1 %702 }
 0x293   : > { %900 = vrsqrt.f32 %v609_v62  ;;  %v704_v0 = vmul.f32 0.0078125, %v703_v63 }
 0x295   : > { %v705_v1 = vadd.f32 1e-12, %v704_v0 }
 0x297   : > { %902 = vrsqrt.f32 %v705_v1 }
 0x299   : > { %v899_v2 = vpop.eup %898 }
 0x29a   : > { %v506_v4 = vmul.f32 %v899_v2, %v499_v48 }
 0x29c   : > { %v511_v6 = vmul.f32 %v816_v3, %v506_v4 }
 0x29d   : > { %v901_v7 = vpop.eup %900 }
 0x29e   : > { %v516_v8 = vadd.f32 %v817_v5, %v511_v6  ;;  %v611_v9 = vmul.f32 %v901_v7, %v604_v53 }
 0x2a0   : > { %517 = vst [vmem:[%s380_s24] sm:$0xff] %v516_v8  ;;  %v612_v10 = vmul.f32 %v816_v3, %v611_v9 }
 0x2a1   : > { %v903_v11 = vpop.eup %902 }
 0x2a2   : > { %v613_v12 = vadd.f32 %v817_v5, %v612_v10  ;;  %v707_v13 = vmul.f32 %v903_v11, %v700_v54 }
 0x2a4   : > { %614 = vst [vmem:[%s380_s24 + $0x8] sm:$0xff] %v613_v12  ;;  %v708_v14 = vmul.f32 %v816_v3, %v707_v13 }
 0x2a6   : > { %v709_v15 = vadd.f32 %v817_v5, %v708_v14 }
 0x2a8   : > { %710 = vst [vmem:[%s380_s24 + $0x10] sm:$0xff] %v709_v15 }
 0x2a9 PF: > { %s19_s30 = sadd.s32 1, %s910_s30  }
 0x2aa   : > { %p16_p4 = scmp.ge.s32.totalorder %s19_s30, 4  }
 0x2ac   :  { %18 = sbr.rel (!%p16_p4) target bundleno = 1 (0x1), region = 95 }

</bundles_post_ra>
